<compile_context>
chip_gen: v7x
topology: tpu7x:2x2x1
jax: 0.10.0
libtpu: 0.0.40
codegen_flags: <defaults>
</compile_context>

<pallas_src>
import functools

import jax
import jax.numpy as jnp
from jax import lax
from jax.experimental import pallas as pl
from jax.experimental.pallas import tpu as pltpu

OUT_FEATURES = 128
BN_EPS = 1e-5

# Keep per-step VMEM comfortably inside v7x's 32 MiB scoped / 64 MiB physical.
_VMEM_LIMIT_BYTES = 32 << 20
_FUSED_VMEM_BUDGET = 20 << 20
_DEFAULT_BATCH_TILE = 512


# ---------------------------------------------------------------------------
# Small/medium batch: one fused call, whole (B, F) block per branch.
# ---------------------------------------------------------------------------
def _fused_branch_kernel(x_ref, w_ref, o_ref):
    # x_ref: (B, F), w_ref: (F, 128) -- the leading branch dim is squeezed.
    # bf16 operands, f32 MXU accumulation.
    h = jnp.dot(x_ref[...].astype(jnp.bfloat16),
                w_ref[...].astype(jnp.bfloat16),
                preferred_element_type=jnp.float32)
    # Linear bias omitted on purpose: it cancels against the batch-mean subtraction.
    mean = jnp.mean(h, axis=0, keepdims=True)
    centered = h - mean
    var = jnp.mean(centered * centered, axis=0, keepdims=True)  # biased (divide by N)
    o_ref[...] = (centered * lax.rsqrt(var + BN_EPS)).astype(o_ref.dtype)


def _forward_fused(x_stacked, w_stacked):
    """x_stacked: (2, B, F) f32, w_stacked: (2, F, 128) f32 -> (2, B, 128) f32."""
    _, B, F = x_stacked.shape
    return pl.pallas_call(
        _fused_branch_kernel,
        out_shape=jax.ShapeDtypeStruct((2, B, OUT_FEATURES), jnp.float32),
        grid=(2,),  # one grid step per branch
        in_specs=[
            pl.BlockSpec((None, B, F), lambda br: (br, 0, 0)),
            pl.BlockSpec((None, F, OUT_FEATURES), lambda br: (br, 0, 0)),
        ],
        out_specs=pl.BlockSpec((None, B, OUT_FEATURES), lambda br: (br, 0, 0)),
        compiler_params=pltpu.CompilerParams(
            dimension_semantics=("parallel",),  # the 2 branches -> 2 TCs on v7x
            vmem_limit_bytes=_VMEM_LIMIT_BYTES,
        ),
    )(x_stacked, w_stacked)


# ---------------------------------------------------------------------------
# Large batch: tiled two-pass path with global BatchNorm statistics.
# ---------------------------------------------------------------------------
def _matmul_stats_kernel(total_b, x_ref, w_ref, h_ref, mean_ref, rstd_ref):
    # Grid: (branch [parallel], batch-tile [arbitrary, reduction-last]).
    # x_ref: (TB, F), w_ref: (F, 128), h_ref: (TB, 128),
    # mean_ref / rstd_ref: (1, 128) accumulators resident across the batch axis.
    bi = pl.program_id(1)

    @pl.when(bi == 0)
    def _():
        mean_ref[...] = jnp.zeros_like(mean_ref)
        rstd_ref[...] = jnp.zeros_like(rstd_ref)

    h = jnp.dot(x_ref[...].astype(jnp.bfloat16),
                w_ref[...].astype(jnp.bfloat16),
                preferred_element_type=jnp.float32)
    h_ref[...] = h

    # Accumulate global per-feature sum and sum-of-squares.  Zero-padded batch
    # rows contribute exactly zero (no bias), so padding does not bias the stats.
    mean_ref[...] += jnp.sum(h, axis=0, keepdims=True)
    rstd_ref[...] += jnp.sum(h * h, axis=0, keepdims=True)

    @pl.when(bi == pl.num_programs(1) - 1)
    def _():
        inv_n = 1.0 / total_b                       # true (unpadded) batch size
        mean = mean_ref[...] * inv_n
        var = rstd_ref[...] * inv_n - mean * mean   # E[h^2] - E[h]^2 (biased)
        mean_ref[...] = mean
        rstd_ref[...] = lax.rsqrt(var + BN_EPS)


def _normalize_kernel(h_ref, mean_ref, rstd_ref, o_ref):
    o_ref[...] = ((h_ref[...] - mean_ref[...]) * rstd_ref[...]).astype(o_ref.dtype)


def _forward_tiled(x_stacked, w_stacked, tile_b=_DEFAULT_BATCH_TILE):
    """Large-batch path with global BN statistics.  Returns (2, B, 128) f32."""
    _, B, F = x_stacked.shape
    tile_b = max(8, (tile_b // 8) * 8)              # sublane-aligned batch tile
    b_pad = ((B + tile_b - 1) // tile_b) * tile_b
    if b_pad != B:
        # Zero rows give h == 0 exactly (no bias), so statistics stay correct
        # as long as we divide by the true batch size in the finalize step.
        x_stacked = jnp.pad(x_stacked, ((0, 0), (0, b_pad - B), (0, 0)))
    nb = b_pad // tile_b

    # Pass 1: H = X @ W per batch tile + global per-feature mean / rstd.
    h, mean, rstd = pl.pallas_call(
        functools.partial(_matmul_stats_kernel, B),
        out_shape=(
            jax.ShapeDtypeStruct((2, b_pad, OUT_FEATURES), jnp.float32),
            jax.ShapeDtypeStruct((2, 1, OUT_FEATURES), jnp.float32),
            jax.ShapeDtypeStruct((2, 1, OUT_FEATURES), jnp.float32),
        ),
        grid=(2, nb),
        in_specs=[
            pl.BlockSpec((None, tile_b, F), lambda br, bi: (br, bi, 0)),
            pl.BlockSpec((None, F, OUT_FEATURES), lambda br, bi: (br, 0, 0)),
        ],
        out_specs=(
            pl.BlockSpec((None, tile_b, OUT_FEATURES), lambda br, bi: (br, bi, 0)),
            pl.BlockSpec((None, 1, OUT_FEATURES), lambda br, bi: (br, 0, 0)),
            pl.BlockSpec((None, 1, OUT_FEATURES), lambda br, bi: (br, 0, 0)),
        ),
        compiler_params=pltpu.CompilerParams(
            dimension_semantics=("parallel", "arbitrary"),
            vmem_limit_bytes=_VMEM_LIMIT_BYTES,
        ),
    )(x_stacked, w_stacked)

    # Pass 2: normalize each H tile with the global statistics.
    out = pl.pallas_call(
        _normalize_kernel,
        out_shape=jax.ShapeDtypeStruct((2, b_pad, OUT_FEATURES), jnp.float32),
        grid=(2, nb),
        in_specs=[
            pl.BlockSpec((None, tile_b, OUT_FEATURES), lambda br, bi: (br, bi, 0)),
            pl.BlockSpec((None, 1, OUT_FEATURES), lambda br, bi: (br, 0, 0)),
            pl.BlockSpec((None, 1, OUT_FEATURES), lambda br, bi: (br, 0, 0)),
        ],
        out_specs=pl.BlockSpec((None, tile_b, OUT_FEATURES),
                               lambda br, bi: (br, bi, 0)),
        compiler_params=pltpu.CompilerParams(
            dimension_semantics=("parallel", "parallel"),
            vmem_limit_bytes=_VMEM_LIMIT_BYTES,
        ),
    )(h, mean, rstd)
    return out[:, :B, :]


# ---------------------------------------------------------------------------
# Public forward + params + reference
# ---------------------------------------------------------------------------
def _fused_vmem_bytes(B, F):
    x = B * F * 4
    w = F * OUT_FEATURES * 4
    o = B * OUT_FEATURES * 4
    h = B * OUT_FEATURES * 4
    bf16_tmp = (B * F + F * OUT_FEATURES) * 2
    return 2 * (x + w + o) + h + bf16_tmp  # double-buffered I/O + temporaries


def correlator_forward(x1, x2, params, *, batch_tile=_DEFAULT_BATCH_TILE):
    """Forward pass of Correlator: returns (output1, output2)."""
    B, F = x1.shape
    x_stacked = jnp.stack([x1, x2], axis=0)     # (2, B, F)
    w_stacked = params["w_t"]                   # (2, F, 128), pre-transposed
    if _fused_vmem_bytes(B, F) <= _FUSED_VMEM_BUDGET:
        out = _forward_fused(x_stacked, w_stacked)
    else:
        out = _forward_tiled(x_stacked, w_stacked, batch_tile)
    return out[0], out[1]


def init_params(key, input_features):
    """Deterministic init mimicking nn.Linear's default uniform ranges.

    Weights are stored branch-stacked and pre-transposed: w_t is (2, F, 128).
    The Linear biases are kept for reference/compatibility but are NOT used by
    the kernels (they cancel exactly against BatchNorm's batch-mean
    subtraction).  BatchNorm1d(affine=False) has no learnable parameters, and
    its running stats do not affect the training-mode forward output.
    """
    kw, kb = jax.random.split(key)
    bound = 1.0 / float(input_features) ** 0.5
    w_t = jax.random.uniform(kw, (2, input_features, OUT_FEATURES),
                             jnp.float32, -bound, bound)
    b = jax.random.uniform(kb, (2, 1, OUT_FEATURES), jnp.float32, -bound, bound)
    return {"w_t": w_t, "b": b}


def _reference(x1, x2, params):
    """Pure-JAX reference (includes the Linear bias; BN cancels it exactly)."""
    def branch(x, w_t, b):
        h = jnp.dot(x.astype(jnp.bfloat16), w_t.astype(jnp.bfloat16),
                    preferred_element_type=jnp.float32) + b
        mean = h.mean(axis=0, keepdims=True)
        var = ((h - mean) ** 2).mean(axis=0, keepdims=True)
        return (h - mean) / jnp.sqrt(var + BN_EPS)
    return (branch(x1, params["w_t"][0], params["b"][0]),
            branch(x2, params["w_t"][1], params["b"][1]))


if __name__ == "__main__":
    batch = 8
    input_features = 32

    key = jax.random.PRNGKey(0)
    kx1, kx2, kp, ky1, ky2 = jax.random.split(key, 5)
    x1 = jax.random.normal(kx1, (batch, input_features), jnp.float32)
    x2 = jax.random.normal(kx2, (batch, input_features), jnp.float32)
    params = init_params(kp, input_features)

    # Small-batch fused path (single pallas_call, branch axis parallel).
    out1, out2 = correlator_forward(x1, x2, params)
    jax.block_until_ready((out1, out2))
    ref1, ref2 = _reference(x1, x2, params)
    assert out1.shape == (batch, OUT_FEATURES)
    assert out2.shape == (batch, OUT_FEATURES)
    assert jnp.allclose(out1, ref1, atol=1e-3, rtol=1e-3)
    assert jnp.allclose(out2, ref2, atol=1e-3, rtol=1e-3)

    # Exercise the tiled large-batch path (global-stat reduction + padding).
    big_b = 200
    y1 = jax.random.normal(ky1, (big_b, input_features), jnp.float32)
    y2 = jax.random.normal(ky2, (big_b, input_features), jnp.float32)
    tout = _forward_tiled(jnp.stack([y1, y2], axis=0), params["w_t"], tile_b=128)
    jax.block_until_ready(tout)
    tref1, tref2 = _reference(y1, y2, params)
    assert tout.shape == (2, big_b, OUT_FEATURES)
    assert jnp.allclose(tout[0], tref1, atol=1e-3, rtol=1e-3)
    assert jnp.allclose(tout[1], tref2, atol=1e-3, rtol=1e-3)

    print("KERNEL_OK")
</pallas_src>

<mosaic_0001>
module attributes {stable_mosaic.version = 11 : i64} {
  func.func @_fused_branch_kernel(%arg0: i32, %arg1: memref<1x8x32xf32, #tpu.memory_space<vmem>>, %arg2: memref<1x32x128xf32, #tpu.memory_space<vmem>>, %arg3: memref<1x8x128xf32, #tpu.memory_space<vmem>>) attributes {dimension_semantics = [#tpu.dimension_semantics<parallel>], iteration_bounds = array<i64: 2>, scalar_prefetch = 0 : i64, scratch_operands = 0 : i64, tpu.core_type = #tpu.core_type<tc>, window_params = [{transform_indices = @transform_0, window_bounds = array<i64: 1, 8, 32>}, {transform_indices = @transform_1, window_bounds = array<i64: 1, 32, 128>}, {transform_indices = @transform_2, window_bounds = array<i64: 1, 8, 128>}]} {
    %c0 = arith.constant 0 : index
    %c0_0 = arith.constant 0 : index
    %c0_1 = arith.constant 0 : index
    %0 = vector.load %arg1[%c0, %c0_0, %c0_1] : memref<1x8x32xf32, #tpu.memory_space<vmem>>, vector<1x8x32xf32>
    %1 = vector.shape_cast %0 : vector<1x8x32xf32> to vector<8x32xf32>
    %2 = arith.truncf %1 : vector<8x32xf32> to vector<8x32xbf16>
    %c0_2 = arith.constant 0 : index
    %c0_3 = arith.constant 0 : index
    %c0_4 = arith.constant 0 : index
    %3 = vector.load %arg2[%c0_2, %c0_3, %c0_4] : memref<1x32x128xf32, #tpu.memory_space<vmem>>, vector<1x32x128xf32>
    %4 = vector.shape_cast %3 : vector<1x32x128xf32> to vector<32x128xf32>
    %5 = arith.truncf %4 : vector<32x128xf32> to vector<32x128xbf16>
    %cst = arith.constant dense<0.000000e+00> : vector<8x128xf32>
    %6 = tpu.matmul %2, %5, %cst {dimension_numbers = #tpu.dot_dimension_numbers<[1], [0], [0], [1], [0, 0, 1, 1], [], []>} : vector<8x32xbf16>, vector<32x128xbf16>, vector<8x128xf32> -> vector<8x128xf32>
    %cst_5 = arith.constant dense<0.000000e+00> : vector<128xf32>
    %7 = vector.multi_reduction <add>, %6, %cst_5 [0] : vector<8x128xf32> to vector<128xf32>
    %8 = vector.shape_cast %7 : vector<128xf32> to vector<1x128xf32>
    %cst_6 = arith.constant 8.000000e+00 : f32
    %9 = vector.broadcast %cst_6 : f32 to vector<1x128xf32>
    %10 = arith.divf %8, %9 : vector<1x128xf32>
    %11 = vector.broadcast %10 : vector<1x128xf32> to vector<8x128xf32>
    %12 = arith.subf %6, %11 : vector<8x128xf32>
    %13 = arith.mulf %12, %12 : vector<8x128xf32>
    %cst_7 = arith.constant dense<0.000000e+00> : vector<128xf32>
    %14 = vector.multi_reduction <add>, %13, %cst_7 [0] : vector<8x128xf32> to vector<128xf32>
    %15 = vector.shape_cast %14 : vector<128xf32> to vector<1x128xf32>
    %cst_8 = arith.constant 8.000000e+00 : f32
    %16 = vector.broadcast %cst_8 : f32 to vector<1x128xf32>
    %17 = arith.divf %15, %16 : vector<1x128xf32>
    %cst_9 = arith.constant 9.99999974E-6 : f32
    %18 = vector.broadcast %cst_9 : f32 to vector<1x128xf32>
    %19 = arith.addf %17, %18 : vector<1x128xf32>
    %20 = math.rsqrt %19 : vector<1x128xf32>
    %21 = vector.broadcast %20 : vector<1x128xf32> to vector<8x128xf32>
    %22 = arith.mulf %12, %21 : vector<8x128xf32>
    %c0_10 = arith.constant 0 : index
    %c0_11 = arith.constant 0 : index
    %c0_12 = arith.constant 0 : index
    %23 = vector.load %arg3[%c0_10, %c0_11, %c0_12] : memref<1x8x128xf32, #tpu.memory_space<vmem>>, vector<1x8x128xf32>
    %24 = vector.shape_cast %23 : vector<1x8x128xf32> to vector<8x128xf32>
    %25 = vector.shape_cast %22 : vector<8x128xf32> to vector<1x8x128xf32>
    tpu.vector_store %arg3[%c0_10, %c0_11, %c0_12], %25 {strides = array<i32>} : memref<1x8x128xf32, #tpu.memory_space<vmem>>, vector<1x8x128xf32>,
    return
  }
  func.func @transform_0(%arg0: i32) -> (i32, i32, i32) {
    %c0_i32 = arith.constant 0 : i32
    %c0_i32_0 = arith.constant 0 : i32
    %c0_i32_1 = arith.constant 0 : i32
    return %arg0, %c0_i32, %c0_i32_0 : i32, i32, i32
  }
  func.func @transform_1(%arg0: i32) -> (i32, i32, i32) {
    %c0_i32 = arith.constant 0 : i32
    %c0_i32_0 = arith.constant 0 : i32
    %c0_i32_1 = arith.constant 0 : i32
    return %arg0, %c0_i32, %c0_i32_0 : i32, i32, i32
  }
  func.func @transform_2(%arg0: i32) -> (i32, i32, i32) {
    %c0_i32 = arith.constant 0 : i32
    %c0_i32_0 = arith.constant 0 : i32
    %c0_i32_1 = arith.constant 0 : i32
    return %arg0, %c0_i32, %c0_i32_0 : i32, i32, i32
  }
}

</mosaic_0001>

<bundles_post_ra>
// kernel: tpu_custom_call.1
= control target key start
LH: loop header
LB: loop body
LE: loop exit
PB: predicated region body
PF: predicated region fallthrough
CT: control target
= control target key end

     0   :  { %7 = vsyncpa [#allocation3], 0  ;;  %s836_s0 = inlined_call_operand.hbm [shape: f32[2,8,32], index: 0, kind: input, shape index: {}]   ;;  %s837_s1 = inlined_call_operand.hbm [shape: f32[2,32,128], index: 1, kind: input, shape index: {}]   ;;  %s838_s2 = inlined_call_operand.hbm [shape: f32[2,8,128], index: 2, kind: output, shape index: {}]  }
   0x1   :  { %9 = vsyncpa [#allocation3 + $0x1], 0 }
   0x2   :  { %10 = vsyncpa [#allocation6], 0 }
   0x3   :  { %12 = vsyncpa [#allocation6 + $0x1], 0 }
   0x4   :  { %13 = vsyncpa [#allocation4], 0 }
   0x5   :  { %15 = vsyncpa [#allocation4 + $0x1], 0  ;;  %s620_s9 = smov 0   ;;  %s622_s10 = smov 0  }
   0x6   :  { %s624_s11 = smov 0   ;;  %s626_s12 = smov 0  }
   0x7 LB: > { %s641_s13 = sadd.s32 4294967295, %s596_s12   ;;  %s380_s14 = sadd.s32 4294967294, %s596_s12   ;;  %s596_s12 = sphi %s626_s12, %s856_s12   ;;  %s592_s11 = sphi %s624_s11, %s855_s11   ;;  %s588_s10 = sphi %s622_s10, %s854_s10   ;;  %s584_s9 = sphi %s620_s9, %s853_s9  }
   0x8   : > { %s645_s15 = sadd.s32 1, %s596_s12   ;;  %s28_s16 = sadd.s32 1, %s592_s11 }
   0x9   : > { %s25_s17 = ssub.s32 %s596_s12, %s645_s15  ;;  %p35_p0 = scmp.ne.s32.totalorder %s592_s11, %s588_s10 }
   0xa   : > { %p26_p1 = scmp.eq.s32.totalorder %s25_s17, 0  ;;  %p36_p2 = scmp.eq.s32.totalorder %s596_s12, 0 }
   0xb   : > { %p41_p3 = scmp.ne.s32.totalorder %s588_s10, %s584_s9  ;;  %p42_p4 = scmp.eq.s32.totalorder %s641_s13, 0 }
   0xc   : > { %s657_s18 = scalar_select %p26_p1, %s592_s11, %s28_s16  }
   0xd   : > { %p659_p5 = por %p36_p2, %p35_p0  ;;  %p663_p6 = por %p42_p4, %p41_p3 }
   0xe   : > { %p91_p7 = scmp.eq.s32.totalorder %s641_s13, 1  ;;  %p97_p8 = scmp.eq.s32.totalorder %s380_s14, 1 }
   0xf   : > { %s842_s20 = scalar_select %p663_p6, 1, 0 }
  0x10   : > { %p426_p10 = scmp.lt.s32.totalorder %s596_s12, 2  ;;  %p670_p11 = por %p91_p7, %p35_p0 }
  0x11   : > { %p674_p12 = por %p97_p8, %p41_p3  ;;  %s679_s23 = sand.u32 1, %s592_s11  }
  0x12   : > { %s843_s21 = scalar_select %p670_p11, 1, 0 }
  0x13   : > { %s844_s22 = scalar_select %p674_p12, 1, 0 }
  0x14   : > { %s384_s24 = sshll.u32 %s596_s12, 7  ;;  %s383_s25 = sshll.u32 %s679_s23, 3 }
  0x15   : > { %s686_s28 = scalar_lea.hbm %s836_s0, %s384_s24  ;;  %s121_s29 = scalar_lea.vmem [#allocation2], %s383_s25 }
  0x16   : > { %s128_s30 = sshll.u32 %s121_s29, 4  ;;  %p690_p13 = pnand %p426_p10, %p659_p5  ;;  %s694_s30 = int_to_ptr.vmem [resolvable:$true] %s128_s30 }
  0x17   : > { %s118_s4 = scalar_lea.sflag [#allocation3], %s679_s23  ;;  %s466_s5 = scalar_lea.hbm %s686_s28, 128 }
  0x18   : > { %p467_p2 = scmp.ne.s32.totalorder %s686_s28, %s466_s5  ;;  %p468_p3 = pneg %p690_p13 }
  0x19   : > { %s471_s8 = scalar_lea.hbm %s836_s0, 256  ;;  %p472_p5 = scmp.lt.u32.totalorder %s686_s28, %s836_s0 }
  0x1a   : > { %p469_p4 = pnand %p468_p3, %p467_p2  ;;  %p473_p8 = scmp.lt.u32.totalorder %s471_s8, %s466_s5 }
  0x1b   : > { %p475_p9 = scmp.lt.u32.totalorder %s466_s5, %s686_s28 }
  0x1c   : > { %p470_p7 = pneg %p469_p4  ;;  %p474_p10 = por %p473_p8, %p472_p5 }
  0x1e   : > { %p476_p0 = por %p475_p9, %p474_p10 }
  0x20   : > { %p477_p1 = pnand %p476_p0, %p470_p7 }
  0x22   : > { %480 = shalt.err (!%p477_p1)
}
  0x23   : > { %s481_s17 = scalar_lea.vmem %s694_s30, 128  ;;  %s598_s19 = smov [#allocation2]  }
  0x24   : > { %p482_p2 = scmp.ne.s32.totalorder %s694_s30, %s481_s17  ;;  %s486_s24 = sshll.u32 %s598_s19, 4  ;;  %s487_s24 = int_to_ptr.vmem [resolvable:$false] %s486_s24 }
  0x25   : > { %s488_s25 = scalar_lea.vmem %s487_s24, 256  ;;  %p489_p11 = scmp.lt.s32.totalorder %s694_s30, %s487_s24 }
  0x26   : > { %p484_p4 = pnand %p482_p2, %p468_p3  ;;  %p490_p5 = scmp.lt.s32.totalorder %s488_s25, %s481_s17 }
  0x28   : > { %p485_p12 = pneg %p484_p4  ;;  %p491_p8 = por %p490_p5, %p489_p11 }
  0x2a   : > { %p492_p9 = pnand %p491_p8, %p485_p12 }
  0x2c   : > { %495 = shalt.err (!%p492_p9)
}
  0x2d   : > { %418 = dma.hbm_to_vmem [thread:$0]  (!%p690_p13), %s686_s28, 128, %s694_s30, %s118_s4  }
  0x2e   : > { %p846_p0 = scmp.lt.s32.totalorder %s596_s12, 3  ;;  %p847_p1 = scmp.ge.s32.totalorder %s596_s12, 1 }
  0x2f   : > { %s385_s27 = sshll.u32 %s679_s23, 5  ;;  %s397_s29 = sshll.u32 %s596_s12, 9 }
  0x30   : > { %p728_p7 = pnand %p847_p1, %p846_p0  ;;  %s737_s7 = scalar_lea.hbm %s837_s1, %s397_s29 }
  0x31   : > { %s139_s8 = scalar_lea.vmem [#allocation5], %s385_s27  ;;  %s136_s28 = scalar_lea.sflag [#allocation6], %s679_s23 }
  0x32   : > { %s146_s14 = sshll.u32 %s139_s8, 4  ;;  %s496_s30 = scalar_lea.hbm %s737_s7, 512  ;;  %s739_s14 = int_to_ptr.vmem [resolvable:$true] %s146_s14 }
  0x33   : > { %p497_p11 = scmp.ne.s32.totalorder %s737_s7, %s496_s30  ;;  %s501_s17 = scalar_lea.hbm %s837_s1, 1024 }
  0x34   : > { %p502_p2 = scmp.lt.u32.totalorder %s737_s7, %s837_s1  ;;  %p503_p4 = scmp.lt.u32.totalorder %s501_s17, %s496_s30 }
  0x35   : > { %p499_p12 = pnand %p497_p11, %p468_p3  ;;  %p505_p8 = scmp.lt.u32.totalorder %s496_s30, %s737_s7 }
  0x36   : > { %p504_p5 = por %p503_p4, %p502_p2 }
  0x37   : > { %p500_p10 = pneg %p499_p12 }
  0x38   : > { %p506_p9 = por %p505_p8, %p504_p5 }
  0x3a   : > { %p507_p0 = pnand %p506_p9, %p500_p10 }
  0x3c   : > { %510 = shalt.err (!%p507_p0)
}
  0x3d   : > { %s511_s25 = scalar_lea.vmem %s739_s14, 512  ;;  %s599_s27 = smov [#allocation5]  }
  0x3e   : > { %p512_p1 = scmp.ne.s32.totalorder %s739_s14, %s511_s25  ;;  %s516_s29 = sshll.u32 %s599_s27, 4  ;;  %s517_s29 = int_to_ptr.vmem [resolvable:$false] %s516_s29 }
  0x3f   : > { %s518_s5 = scalar_lea.vmem %s517_s29, 1024  ;;  %p519_p6 = scmp.lt.s32.totalorder %s739_s14, %s517_s29 }
  0x40   : > { %p514_p11 = pnand %p512_p1, %p468_p3  ;;  %p520_p2 = scmp.lt.s32.totalorder %s518_s5, %s511_s25 }
  0x42   : > { %p515_p12 = pneg %p514_p11  ;;  %p521_p4 = por %p520_p2, %p519_p6 }
  0x44   : > { %p522_p5 = pnand %p521_p4, %p515_p12 }
  0x46   : > { %525 = shalt.err (!%p522_p5)
}
  0x47   : > { %s600_s6 = smov 128   ;;  %s601_s8 = smov 8  }
  0x48   : > { %421 = dma.hbm_to_vmem [thread:$0]  (!%p690_p13), %s737_s7, 512, %s739_s14, %s136_s28, %s600_s6, %s600_s6, %s601_s8  }
  0x49   : > { %158 = sbr.rel (%p728_p7) target bundleno = 367 (0x16f), region = 28  ;;  %s770_s30 = sand.u32 (!%p728_p7), 1, %s588_s10  }
  0x4a   : > { %s389_s4 = sshll.u32 (!%p728_p7), %s770_s30, 3  ;;  %s161_s16 = scalar_lea.sflag (!%p728_p7), [#allocation3], %s770_s30 }
  0x4b   : > { %s164_s17 = scalar_lea.vmem (!%p728_p7), [#allocation2], %s389_s4  ;;  %p849_p6 = scmp.ne.s32.totalorder (!%p728_p7), %s842_s20, 0 }
  0x50   : > { %571 = dma.done.wait (%p849_p6), %s161_s16, 128  }
  0x51   : > { %573 = vsyncadd (%p849_p6), %s161_s16, 4294967168  ;;  %s390_s23 = sshll.u32 %s770_s30, 5  ;;  %s170_s3 = scalar_lea.sflag [#allocation6], %s770_s30 }
  0x52   : > { %s173_s26 = scalar_lea.vmem [#allocation5], %s390_s23 }
  0x53   : > { %575 = dma.done.wait (%p849_p6), %s170_s3, 512  }
  0x54   : > { %577 = vsyncadd (%p849_p6), %s170_s3, 4294966784  ;;  %v602_v0 = vmov 0.0   ;;  %vm603_vm0 = vmmov 0   ;;  %v202_v1 = vld [vmem:[%s173_s26] sm:$0xff]  ;;  %v203_v2 = vld [vmem:[%s173_s26 + $0x8] sm:$0xff]  ;;  %vm208_vm1 = vcmask 261120  }
  0x55   : > { %401 = vmatprep.subr.bf16.mxu0 %v602_v0  ;;  %405 = vmatprep.mubr.msk.bf16.mxu0 %vm603_vm0, %v602_v0  ;;  %v204_v3 = vld [vmem:[%s173_s26 + $0x10] sm:$0xff]  ;;  %v206_v4 = vpack.c.bf16 %v203_v2, %v202_v1  ;;  %v205_v5 = vld [vmem:[%s173_s26 + $0x18] sm:$0xff]  ;;  %s394_s20 = sshll.u32 %s641_s13, 7  ;;  %s198_s7 = scalar_lea.vmem [#allocation7], %s389_s4 }
  0x56   : > { %v207_v6 = vpack.c.bf16 %v205_v5, %v204_v3  ;;  %v200_v7 = vld [vmem:[%s164_s17] sm:$0xff]  ;;  %s287_s14 = sshll.u32 %s198_s7, 4  ;;  %s792_s24 = scalar_lea.hbm %s838_s2, %s394_s20  ;;  %s794_s14 = int_to_ptr.vmem [resolvable:$true] %s287_s14 }
  0x57   : > { %402 = vmatpush3.bf16.msra.mxu0 %v206_v4  ;;  %v201_v8 = vpack.c.bf16 %v200_v7, %v200_v7  ;;  %s274_s25 = scalar_lea.sflag [#allocation4], %s770_s30  ;;  %s526_s27 = scalar_lea.vmem %s794_s14, 128 }
  0x58   : > { %403 = vmatprep.subr.bf16.mxu0 %v602_v0  ;;  %p527_p13 = scmp.ne.s32.totalorder %s794_s14, %s526_s27  ;;  %p850_p3 = scmp.ne.s32.totalorder %s843_s21, 0 }
  0x59   : > { %s604_s13 = smov [#allocation7]  }
  0x5a   : > { %p528_p7 = pnand %p527_p13, %p850_p3  ;;  %s530_s29 = sshll.u32 %s604_s13, 4  ;;  %s531_s29 = int_to_ptr.vmem [resolvable:$false] %s530_s29 }
  0x5b   : > { %404 = vmatpush3.bf16.msra.mxu0 %v207_v6  ;;  %s532_s5 = scalar_lea.vmem %s531_s29, 256  ;;  %p533_p8 = scmp.lt.s32.totalorder %s794_s14, %s531_s29 }
  0x5c   : > { %p529_p10 = pneg %p528_p7  ;;  %p534_p9 = scmp.lt.s32.totalorder %s532_s5, %s526_s27 }
  0x5e   : > { %406 = vmatmul.mubr.msk.bf16.vlgmr.msra.gmra.mrb[0].mxu0 %vm208_vm1, %v201_v8  ;;  %p535_p0 = por %p534_p9, %p533_p8 }
  0x60   : > { %p536_p1 = pnand %p535_p0, %p529_p10 }
 0x131   : > { %v246_v9 = vpop.f32.mrb[0].mxu0 }
 0x132   : > { %v252_v10 = vrot.slane %v246_v9, 4  ;;  %v407_v11 = vpop.f32.mrb[1].mxu0 }
 0x133   : > { %v249_v12 = vpop.f32.mrb[2].mxu0 }
 0x134   : > { %v253_v13 = vadd.f32 %v252_v10, %v246_v9  ;;  %v408_v14 = vpop.f32.mrb[3].mxu0 }
 0x136   : > { %v254_v15 = vrot.slane %v253_v13, 2 }
 0x138   : > { %v255_v16 = vadd.f32 %v254_v15, %v253_v13 }
 0x13a   : > { %v256_v17 = vrot.slane %v255_v16, 1 }
 0x13c   : > { %v257_v18 = vadd.f32 %v256_v17, %v255_v16 }
 0x13e   : > { %v259_v19 = vmul.f32 0.125, %v257_v18 }
 0x140   : > { %v260_v20 = vsub.f32 %v246_v9, %v259_v19 }
 0x142   : > { %v261_v21 = vmul.f32 %v260_v20, %v260_v20 }
 0x144   : > { %v262_v22 = vrot.slane %v261_v21, 4 }
 0x146   : > { %v263_v23 = vadd.f32 %v262_v22, %v261_v21 }
 0x148   : > { %v264_v24 = vrot.slane %v263_v23, 2 }
 0x14a   : > { %v265_v25 = vadd.f32 %v264_v24, %v263_v23 }
 0x14c   : > { %v266_v26 = vrot.slane %v265_v25, 1 }
 0x14e   : > { %v267_v27 = vadd.f32 %v266_v26, %v265_v25 }
 0x150   : > { %v268_v28 = vmul.f32 0.125, %v267_v27 }
 0x152   : > { %v269_v29 = vadd.f32 1e-05, %v268_v28 }
 0x154   : > { %464 = vrsqrt.f32 %v269_v29 }
 0x15e   : > { %v465_v30 = vpop.eup %464 }
 0x15f   : > { %v271_v31 = vmul.f32 %v465_v30, %v260_v20 }
 0x161   : > { %272 = vst [vmem:[%s198_s7] sm:$0xff] %v271_v31 }
 0x162   : > { %539 = shalt.err (!%p536_p1)
}
 0x163   : > { %s540_s6 = scalar_lea.hbm %s792_s24, 128  ;;  %s544_s4 = scalar_lea.hbm %s838_s2, 256 }
 0x164   : > { %p541_p11 = scmp.ne.s32.totalorder %s792_s24, %s540_s6  ;;  %p545_p4 = scmp.lt.u32.totalorder %s792_s24, %s838_s2 }
 0x165   : > { %p546_p5 = scmp.lt.u32.totalorder %s544_s4, %s540_s6  ;;  %p548_p13 = scmp.lt.u32.totalorder %s540_s6, %s792_s24 }
 0x166   : > { %p542_p12 = pnand %p541_p11, %p850_p3 }
 0x167   : > { %p547_p6 = por %p546_p5, %p545_p4 }
 0x168   : > { %p543_p2 = pneg %p542_p12 }
 0x169   : > { %p549_p7 = por %p548_p13, %p547_p6 }
 0x16b   : > { %p550_p10 = pnand %p549_p7, %p543_p2 }
 0x16d   : > { %553 = shalt.err (!%p550_p10)
}
 0x16e   : > { %413 = dma.vmem_to_hbm [thread:$0]  (%p850_p3), %s794_s14, 128, %s792_s24, %s274_s25  }
 0x16f PF: > { %s299_s23 = sand.u32 1, %s584_s9   ;;  %p851_p8 = scmp.ne.s32.totalorder %s844_s22, 0 }
 0x170   : > { %p852_p9 = scmp.ge.s32.totalorder %s596_s12, 2  ;;  %s300_s3 = scalar_lea.sflag [#allocation4], %s299_s23 }
 0x172   : > { %p423_p0 = pnand %p852_p9, %p851_p8 }
 0x174   : > { %579 = dma.done.wait (!%p423_p0), %s300_s3, 128  }
 0x175   : > { %581 = vsyncadd (!%p423_p0), %s300_s3, 4294967168  ;;  %p18_p1 = scmp.ge.s32.totalorder %s645_s15, 4   ;;  %s853_s9 = smov %s588_s10 }
 0x176   : > { %s854_s10 = smov %s592_s11  ;;  %s855_s11 = smov %s657_s18 }
 0x177   : > { %s856_s12 = smov %s645_s15  ;;  %20 = sbr.rel (!%p18_p1) target bundleno = 7 (0x7), region = 86 }
 0x17e   :  { %305 = vsyncpa [#allocation3], 1 }
 0x17f   :  { %307 = vsyncpa [#allocation3 + $0x1], 1 }
 0x180   :  { %308 = vsyncpa [#allocation6], 1 }
 0x181   :  { %310 = vsyncpa [#allocation6 + $0x1], 1 }
 0x182   :  { %311 = vsyncpa [#allocation4], 1 }
 0x183   :  { %313 = vsyncpa [#allocation4 + $0x1], 1 }

</bundles_post_ra>
